<compile_context>
chip_gen: v7x
topology: tpu7x:2x2x1
jax: 0.10.0
libtpu: 0.0.40
codegen_flags: <defaults>
</compile_context>

<pallas_src>
import functools

import jax
import jax.numpy as jnp
from jax.experimental import pallas as pl
from jax.experimental.pallas import tpu as pltpu


def _round_up(x: int, m: int) -> int:
    return ((x + m - 1) // m) * m


# ---------------------------------------------------------------------------
# Kernel: two MXU matmuls + bias + ReLU, everything BN-folded.
# ---------------------------------------------------------------------------
def head_mlp_kernel(x_ref, w1_ref, b1_ref, w2_ref, b2_ref, out_ref):
    # x: [TB, F] bf16, w1: [F, 256] bf16  ->  f32 accumulation on the MXU.
    h = jnp.dot(x_ref[...], w1_ref[...], preferred_element_type=jnp.float32)
    h = jnp.maximum(h + b1_ref[...], 0.0)          # bias + ReLU (BN1 pre-folded)
    # Tiny second matmul kept in f32; w2/b2 are zero-padded to 128 output lanes
    # so this store is a lane-dense, unmasked full-vreg store.
    y = jnp.dot(h, w2_ref[...], preferred_element_type=jnp.float32) + b2_ref[...]
    out_ref[...] = y.astype(out_ref.dtype)


# ---------------------------------------------------------------------------
# One-time weight preparation (do NOT redo this per forward call).
# ---------------------------------------------------------------------------
def fold_head_params(params, *, eps=1e-5, compute_dtype=jnp.bfloat16, n_out_pad=128):
    """Fold BN into Linear weights, transpose to [in, out], bf16-cast the big
    matmul weight, and pad the 2-wide output to 128 lanes."""
    s1 = params["bn1_gamma"] / jnp.sqrt(params["bn1_var"] + eps)   # [F]
    t1 = params["bn1_beta"] - params["bn1_mean"] * s1              # [F]
    s2 = params["bn2_gamma"] / jnp.sqrt(params["bn2_var"] + eps)   # [256]
    t2 = params["bn2_beta"] - params["bn2_mean"] * s2              # [256]

    w1t = params["w1"].T                                           # [F, 256]
    w2t = params["w2"].T                                           # [256, 2]
    n_out = int(w2t.shape[1])

    w1_f = (w1t * s1[:, None]).astype(compute_dtype)               # [F, 256] bf16
    b1_f = (params["b1"] + t1 @ w1t)[None, :].astype(jnp.float32)  # [1, 256]

    w2_small = w2t * s2[:, None]                                   # [256, 2]
    b2_small = params["b2"] + t2 @ w2t                             # [2]
    w2_f = jnp.zeros((w2t.shape[0], n_out_pad), jnp.float32).at[:, :n_out].set(w2_small)
    b2_f = jnp.zeros((1, n_out_pad), jnp.float32).at[0, :n_out].set(b2_small)

    return {"w1": w1_f, "b1": b1_f, "w2": w2_f, "b2": b2_f, "n_out": n_out}


# ---------------------------------------------------------------------------
# Forward pass.
# ---------------------------------------------------------------------------
def head_forward(gcn_outputs, offsets_gcn, bert_embeddings, folded, *, tb=256):
    """gcn_outputs: [B, N, D], offsets_gcn: [B, 3] int32, bert_embeddings: [B, Db]."""
    B, N, D = gcn_outputs.shape

    # --- glue: gather 3 rows per example (== torch.gather along dim=1),
    #           flatten, and concat with bert embeddings ---
    extracted = jnp.take_along_axis(gcn_outputs, offsets_gcn[:, :, None], axis=1)  # [B,3,D]
    emb = jnp.concatenate([extracted.reshape(B, 3 * D), bert_embeddings], axis=1)  # [B,F]
    f_in = emb.shape[1]

    w1, b1, w2, b2 = folded["w1"], folded["b1"], folded["w2"], folded["b2"]
    hidden = w1.shape[1]      # 256
    n_pad = w2.shape[1]       # 128 (lane-dense padded output)
    n_out = folded["n_out"]   # 2

    # Batch tiling: TB rows per grid step (weights resident), pad B up to a
    # multiple of TB. Small B collapses to a single full-array block.
    # (v5e: tb=128 is enough; v6e/v7x: 256 fills the 256-row MXU.)
    tb = min(tb, _round_up(B, 8))
    b_pad = _round_up(B, tb)
    if b_pad != B:
        emb = jnp.pad(emb, ((0, b_pad - B), (0, 0)))
    emb = emb.astype(w1.dtype)  # bf16 activations for the dominant matmul

    grid = (b_pad // tb,)

    # Advisory cost hint for the XLA scheduler around the custom call.
    flops = 2 * b_pad * f_in * hidden + 2 * b_pad * hidden * n_pad
    bytes_accessed = (
        emb.size * emb.dtype.itemsize
        + w1.size * w1.dtype.itemsize
        + b1.size * b1.dtype.itemsize
        + w2.size * w2.dtype.itemsize
        + b2.size * b2.dtype.itemsize
        + b_pad * n_pad * 4
    )
    cost = pl.CostEstimate(flops=flops, transcendentals=0,
                           bytes_accessed=bytes_accessed)

    out = pl.pallas_call(
        head_mlp_kernel,
        out_shape=jax.ShapeDtypeStruct((b_pad, n_pad), jnp.float32),
        grid=grid,
        in_specs=[
            pl.BlockSpec((tb, f_in), lambda i: (i, 0)),       # activations (tiled)
            pl.BlockSpec((f_in, hidden), lambda i: (0, 0)),   # w1 (resident)
            pl.BlockSpec((1, hidden), lambda i: (0, 0)),      # b1 (resident)
            pl.BlockSpec((hidden, n_pad), lambda i: (0, 0)),  # w2 (resident, padded)
            pl.BlockSpec((1, n_pad), lambda i: (0, 0)),       # b2 (resident, padded)
        ],
        out_specs=pl.BlockSpec((tb, n_pad), lambda i: (i, 0)),
        compiler_params=pltpu.CompilerParams(
            dimension_semantics=("parallel",),  # shard batch tiles across TCs (v7x)
        ),
        cost_estimate=cost,
    )(emb, w1, b1, w2, b2)

    return out[:B, :n_out]


# ---------------------------------------------------------------------------
# Init mirroring Head.__init__ (kaiming_normal linears, BN weight=1/bias=0)
# and a pure-JAX reference for sanity checking.
# ---------------------------------------------------------------------------
def init_head_params(key, gcn_out_size, bert_out_size):
    f_in = bert_out_size + gcn_out_size * 3
    k1, k2 = jax.random.split(key, 2)
    return {
        "bn1_gamma": jnp.ones((f_in,), jnp.float32),
        "bn1_beta": jnp.zeros((f_in,), jnp.float32),
        "bn1_mean": jnp.zeros((f_in,), jnp.float32),
        "bn1_var": jnp.ones((f_in,), jnp.float32),
        "w1": jax.random.normal(k1, (256, f_in), jnp.float32) * jnp.sqrt(2.0 / f_in),
        "b1": jnp.zeros((256,), jnp.float32),
        "bn2_gamma": jnp.ones((256,), jnp.float32),
        "bn2_beta": jnp.zeros((256,), jnp.float32),
        "bn2_mean": jnp.zeros((256,), jnp.float32),
        "bn2_var": jnp.ones((256,), jnp.float32),
        "w2": jax.random.normal(k2, (2, 256), jnp.float32) * jnp.sqrt(2.0 / 256),
        "b2": jnp.zeros((2,), jnp.float32),
    }


def head_reference(gcn_outputs, offsets_gcn, bert_embeddings, params, eps=1e-5):
    B, N, D = gcn_outputs.shape
    extracted = jnp.take_along_axis(gcn_outputs, offsets_gcn[:, :, None], axis=1)
    x = jnp.concatenate([extracted.reshape(B, 3 * D), bert_embeddings], axis=1)
    x = (x - params["bn1_mean"]) / jnp.sqrt(params["bn1_var"] + eps)
    x = x * params["bn1_gamma"] + params["bn1_beta"]
    h = jnp.maximum(x @ params["w1"].T + params["b1"], 0.0)
    h = (h - params["bn2_mean"]) / jnp.sqrt(params["bn2_var"] + eps)
    h = h * params["bn2_gamma"] + params["bn2_beta"]
    return h @ params["w2"].T + params["b2"]


if __name__ == "__main__":
    key = jax.random.PRNGKey(0)
    k_gcn, k_off, k_bert, k_params = jax.random.split(key, 4)

    B = 8                 # batch
    N = 16                # graph nodes per example
    gcn_out_size = 32
    bert_out_size = 32    # F = 3*32 + 32 = 128

    gcn_outputs = jax.random.normal(k_gcn, (B, N, gcn_out_size), jnp.float32)
    offsets_gcn = jax.random.randint(k_off, (B, 3), 0, N, dtype=jnp.int32)
    bert_embeddings = jax.random.normal(k_bert, (B, bert_out_size), jnp.float32)

    params = init_head_params(k_params, gcn_out_size, bert_out_size)

    # One-time weight prep (BN fold, transpose, bf16 cast, 128-lane padding) —
    # kept out of the per-call path.
    folded = fold_head_params(params)
    folded = {k: (jax.block_until_ready(v) if isinstance(v, jax.Array) else v)
              for k, v in folded.items()}

    fwd = jax.jit(functools.partial(head_forward, folded=folded))
    out = jax.block_until_ready(fwd(gcn_outputs, offsets_gcn, bert_embeddings))
    assert out.shape == (B, 2), out.shape

    # Loose tolerance: activations/w1 run in bf16 on the MXU (f32 accumulation).
    ref = head_reference(gcn_outputs, offsets_gcn, bert_embeddings, params)
    assert jnp.allclose(out, ref, atol=1e-1, rtol=1e-1), (out, ref)

    print("KERNEL_OK")
</pallas_src>

<mosaic_0001>
module attributes {stable_mosaic.version = 11 : i64} {
  func.func @head_mlp_kernel(%arg0: i32, %arg1: memref<8x128xbf16, #tpu.memory_space<vmem>>, %arg2: memref<128x256xbf16, #tpu.memory_space<vmem>>, %arg3: memref<1x256xf32, #tpu.memory_space<vmem>>, %arg4: memref<256x128xf32, #tpu.memory_space<vmem>>, %arg5: memref<1x128xf32, #tpu.memory_space<vmem>>, %arg6: memref<8x128xf32, #tpu.memory_space<vmem>>) attributes {dimension_semantics = [#tpu.dimension_semantics<parallel>], iteration_bounds = array<i64: 1>, scalar_prefetch = 0 : i64, scratch_operands = 0 : i64, tpu.core_type = #tpu.core_type<tc>, window_params = [{transform_indices = @transform_0, window_bounds = array<i64: 8, 128>}, {pipeline_mode = #tpu.pipeline_mode<synchronous>, transform_indices = @transform_1, window_bounds = array<i64: 128, 256>}, {pipeline_mode = #tpu.pipeline_mode<synchronous>, transform_indices = @transform_2, window_bounds = array<i64: 1, 256>}, {pipeline_mode = #tpu.pipeline_mode<synchronous>, transform_indices = @transform_3, window_bounds = array<i64: 256, 128>}, {pipeline_mode = #tpu.pipeline_mode<synchronous>, transform_indices = @transform_4, window_bounds = array<i64: 1, 128>}, {transform_indices = @transform_5, window_bounds = array<i64: 8, 128>}]} {
    %c0 = arith.constant 0 : index
    %c0_0 = arith.constant 0 : index
    %0 = vector.load %arg1[%c0, %c0_0] : memref<8x128xbf16, #tpu.memory_space<vmem>>, vector<8x128xbf16>
    %c0_1 = arith.constant 0 : index
    %c0_2 = arith.constant 0 : index
    %1 = vector.load %arg2[%c0_1, %c0_2] : memref<128x256xbf16, #tpu.memory_space<vmem>>, vector<128x256xbf16>
    %cst = arith.constant dense<0.000000e+00> : vector<8x256xf32>
    %2 = tpu.matmul %0, %1, %cst {dimension_numbers = #tpu.dot_dimension_numbers<[1], [0], [0], [1], [0, 0, 1, 1], [], []>} : vector<8x128xbf16>, vector<128x256xbf16>, vector<8x256xf32> -> vector<8x256xf32>
    %c0_3 = arith.constant 0 : index
    %c0_4 = arith.constant 0 : index
    %3 = vector.load %arg3[%c0_3, %c0_4] : memref<1x256xf32, #tpu.memory_space<vmem>>, vector<1x256xf32>
    %4 = vector.broadcast %3 : vector<1x256xf32> to vector<8x256xf32>
    %5 = arith.addf %2, %4 : vector<8x256xf32>
    %cst_5 = arith.constant 0.000000e+00 : f32
    %6 = vector.broadcast %cst_5 : f32 to vector<8x256xf32>
    %7 = arith.maximumf %5, %6 : vector<8x256xf32>
    %c0_6 = arith.constant 0 : index
    %c0_7 = arith.constant 0 : index
    %8 = vector.load %arg4[%c0_6, %c0_7] : memref<256x128xf32, #tpu.memory_space<vmem>>, vector<256x128xf32>
    %cst_8 = arith.constant dense<0.000000e+00> : vector<8x128xf32>
    %9 = tpu.matmul %7, %8, %cst_8 {dimension_numbers = #tpu.dot_dimension_numbers<[1], [0], [0], [1], [0, 0, 1, 1], [], []>} : vector<8x256xf32>, vector<256x128xf32>, vector<8x128xf32> -> vector<8x128xf32>
    %c0_9 = arith.constant 0 : index
    %c0_10 = arith.constant 0 : index
    %10 = vector.load %arg5[%c0_9, %c0_10] : memref<1x128xf32, #tpu.memory_space<vmem>>, vector<1x128xf32>
    %11 = vector.broadcast %10 : vector<1x128xf32> to vector<8x128xf32>
    %12 = arith.addf %9, %11 : vector<8x128xf32>
    %c0_11 = arith.constant 0 : index
    %c0_12 = arith.constant 0 : index
    %13 = vector.load %arg6[%c0_11, %c0_12] : memref<8x128xf32, #tpu.memory_space<vmem>>, vector<8x128xf32>
    tpu.vector_store %arg6[%c0_11, %c0_12], %12 {strides = array<i32>} : memref<8x128xf32, #tpu.memory_space<vmem>>, vector<8x128xf32>,
    return
  }
  func.func @transform_0(%arg0: i32) -> (i32, i32) {
    %c0_i32 = arith.constant 0 : i32
    %c0_i32_0 = arith.constant 0 : i32
    return %arg0, %c0_i32 : i32, i32
  }
  func.func @transform_1(%arg0: i32) -> (i32, i32) {
    %c0_i32 = arith.constant 0 : i32
    %c0_i32_0 = arith.constant 0 : i32
    %c0_i32_1 = arith.constant 0 : i32
    return %c0_i32, %c0_i32_0 : i32, i32
  }
  func.func @transform_2(%arg0: i32) -> (i32, i32) {
    %c0_i32 = arith.constant 0 : i32
    %c0_i32_0 = arith.constant 0 : i32
    %c0_i32_1 = arith.constant 0 : i32
    return %c0_i32, %c0_i32_0 : i32, i32
  }
  func.func @transform_3(%arg0: i32) -> (i32, i32) {
    %c0_i32 = arith.constant 0 : i32
    %c0_i32_0 = arith.constant 0 : i32
    %c0_i32_1 = arith.constant 0 : i32
    return %c0_i32, %c0_i32_0 : i32, i32
  }
  func.func @transform_4(%arg0: i32) -> (i32, i32) {
    %c0_i32 = arith.constant 0 : i32
    %c0_i32_0 = arith.constant 0 : i32
    %c0_i32_1 = arith.constant 0 : i32
    return %c0_i32, %c0_i32_0 : i32, i32
  }
  func.func @transform_5(%arg0: i32) -> (i32, i32) {
    %c0_i32 = arith.constant 0 : i32
    %c0_i32_0 = arith.constant 0 : i32
    return %arg0, %c0_i32 : i32, i32
  }
}

</mosaic_0001>

<bundles_post_ra>
// kernel: head_forward.1
= control target key start
LH: loop header
LB: loop body
LE: loop exit
PB: predicated region body
PF: predicated region fallthrough
CT: control target
= control target key end

     0   :  { %v396_v1 = vmov 0   ;;  %s583_s1 = inlined_call_operand.vmem [shape: bf16[128,256], index: 1, kind: input, shape index: {}]   ;;  %s584_s3 = inlined_call_operand.vmem [shape: f32[256,128], index: 3, kind: input, shape index: {}]   ;;  %s585_s0 = inlined_call_operand.vmem [shape: bf16[8,128], index: 0, kind: input, shape index: {}]   ;;  %s586_s2 = inlined_call_operand.vmem [shape: f32[1,256], index: 2, kind: input, shape index: {}]   ;;  %s587_s4 = inlined_call_operand.vmem [shape: f32[1,128], index: 4, kind: input, shape index: {}]   ;;  %s588_s5 = inlined_call_operand.vmem [shape: f32[8,128], index: 5, kind: output, shape index: {}]  }
   0x1   :  { %v372_v0 = vld [vmem:[%s583_s1 + $0x4] ss:$8 sps:$4 sm:$0xff]   ;;  %162 = vmatprep.mubr.bf16.mxu0 %v396_v1  ;;  %v374_v2 = vld [vmem:[%s583_s1] ss:$8 sps:$4 sm:$0xff]   ;;  %v375_v3 = vld [vmem:[%s583_s1 + $0x14] ss:$8 sps:$4 sm:$0xff]  }
   0x2   :  { %130 = vmatprep.subr.bf16.mxu0 %v372_v0  ;;  %v377_v4 = vld [vmem:[%s583_s1 + $0x10] ss:$8 sps:$4 sm:$0xff]   ;;  %v378_v5 = vld [vmem:[%s583_s1 + $0x24] ss:$8 sps:$4 sm:$0xff]   ;;  %v380_v6 = vld [vmem:[%s583_s1 + $0x20] ss:$8 sps:$4 sm:$0xff]  }
   0x3   :  { %131 = vmatpush1.bf16.msra.mxu0 %v374_v2  ;;  %v381_v7 = vld [vmem:[%s583_s1 + $0x34] ss:$8 sps:$4 sm:$0xff]   ;;  %v383_v8 = vld [vmem:[%s583_s1 + $0x30] ss:$8 sps:$4 sm:$0xff]   ;;  %v384_v9 = vld [vmem:[%s583_s1 + $0x44] ss:$8 sps:$4 sm:$0xff]   ;;  %v40_v2 = vlaneseq }
   0x4   :  { %132 = vmatprep.subr.bf16.mxu0 %v375_v3  ;;  %v189_v10 = vld [vmem:[%s584_s3 + $0x80] sm:$0xff]  ;;  %v190_v11 = vld [vmem:[%s584_s3 + $0x88] sm:$0xff]  ;;  %v191_v15 = vld [vmem:[%s584_s3 + $0x90] sm:$0xff] }
   0x5   :  { %v173_v12 = vld [vmem:[%s584_s3] sm:$0xff]  ;;  %v339_v13 = vpack.c.bf16 %v190_v11, %v189_v10  ;;  %v174_v14 = vld [vmem:[%s584_s3 + $0x8] sm:$0xff]  ;;  %v192_v16 = vld [vmem:[%s584_s3 + $0x98] sm:$0xff]  ;;  %v41_v3 = vshrl.u32 %v40_v2, 7 }
   0x6   :  { %v341_v17 = vpack.c.bf16 %v174_v14, %v173_v12  ;;  %v343_v18 = vpack.c.bf16 %v192_v16, %v191_v15  ;;  %v175_v19 = vld [vmem:[%s584_s3 + $0x10] sm:$0xff]  ;;  %v176_v20 = vld [vmem:[%s584_s3 + $0x18] sm:$0xff]  ;;  %v193_v21 = vld [vmem:[%s584_s3 + $0xa0] sm:$0xff] }
   0x7   :  { %133 = vmatpush1.bf16.msra.mxu0 %v377_v4  ;;  %340 = vmatprep.subr.bf16.mxu1 %v339_v13  ;;  %v194_v22 = vld [vmem:[%s584_s3 + $0xa8] sm:$0xff]  ;;  %v345_v24 = vpack.c.bf16 %v176_v20, %v175_v19  ;;  %v387_v25 = vld [vmem:[%s583_s1 + $0x54] ss:$8 sps:$4 sm:$0xff]   ;;  %v177_v27 = vld [vmem:[%s584_s3 + $0x20] sm:$0xff]  ;;  %v42_v4 = vsub.s32 0, %v41_v3 }
   0x8   :  { %134 = vmatprep.subr.bf16.mxu0 %v378_v5  ;;  %v386_v23 = vld [vmem:[%s583_s1 + $0x40] ss:$8 sps:$4 sm:$0xff]   ;;  %342 = vmatpush3.bf16.msra.mxu1 %v341_v17  ;;  %v347_v26 = vpack.c.bf16 %v194_v22, %v193_v21  ;;  %v195_v29 = vld [vmem:[%s584_s3 + $0xb0] sm:$0xff]  ;;  %v196_v30 = vld [vmem:[%s584_s3 + $0xb8] sm:$0xff] }
   0x9   :  { %344 = vmatprep.subr.bf16.mxu1 %v343_v18  ;;  %v178_v28 = vld [vmem:[%s584_s3 + $0x28] sm:$0xff]  ;;  %v389_v31 = vld [vmem:[%s583_s1 + $0x50] ss:$8 sps:$4 sm:$0xff]   ;;  %v351_v34 = vpack.c.bf16 %v196_v30, %v195_v29  ;;  %v197_v37 = vld [vmem:[%s584_s3 + $0xc0] sm:$0xff] }
   0xa   :  { %v349_v32 = vpack.c.bf16 %v178_v28, %v177_v27  ;;  %v390_v33 = vld [vmem:[%s583_s1 + $0x64] ss:$8 sps:$4 sm:$0xff]   ;;  %v179_v35 = vld [vmem:[%s584_s3 + $0x30] sm:$0xff]  ;;  %v180_v36 = vld [vmem:[%s584_s3 + $0x38] sm:$0xff] }
   0xb   :  { %135 = vmatpush1.bf16.msra.mxu0 %v380_v6  ;;  %v198_v38 = vld [vmem:[%s584_s3 + $0xc8] sm:$0xff]  ;;  %v353_v40 = vpack.c.bf16 %v180_v36, %v179_v35  ;;  %v393_v41 = vld [vmem:[%s583_s1 + $0x74] ss:$8 sps:$4 sm:$0xff]   ;;  %v181_v43 = vld [vmem:[%s584_s3 + $0x40] sm:$0xff]  ;;  %v46_v6 = vsub.s32 1, %v41_v3 }
   0xc   :  { %136 = vmatprep.subr.bf16.mxu0 %v381_v7  ;;  %346 = vmatpush3.bf16.msra.mxu1 %v345_v24  ;;  %v392_v39 = vld [vmem:[%s583_s1 + $0x60] ss:$8 sps:$4 sm:$0xff]   ;;  %v355_v42 = vpack.c.bf16 %v198_v38, %v197_v37  ;;  %v199_v45 = vld [vmem:[%s584_s3 + $0xd0] sm:$0xff]  ;;  %v200_v46 = vld [vmem:[%s584_s3 + $0xd8] sm:$0xff] }
   0xd   :  { %348 = vmatprep.subr.bf16.mxu1 %v347_v26  ;;  %v182_v44 = vld [vmem:[%s584_s3 + $0x48] sm:$0xff]  ;;  %v395_v47 = vld [vmem:[%s583_s1 + $0x70] ss:$8 sps:$4 sm:$0xff]   ;;  %v359_v49 = vpack.c.bf16 %v200_v46, %v199_v45  ;;  %v201_v52 = vld [vmem:[%s584_s3 + $0xe0] sm:$0xff] }
   0xe   :  { %v357_v48 = vpack.c.bf16 %v182_v44, %v181_v43  ;;  %v183_v50 = vld [vmem:[%s584_s3 + $0x50] sm:$0xff]  ;;  %v184_v51 = vld [vmem:[%s584_s3 + $0x58] sm:$0xff]  ;;  %v202_v53 = vld [vmem:[%s584_s3 + $0xe8] sm:$0xff] }
   0xf   :  { %137 = vmatpush1.bf16.msra.mxu0 %v383_v8  ;;  %v21_v54 = vld [vmem:[%s585_s0] sm:$0xf]  ;;  %v361_v55 = vpack.c.bf16 %v184_v51, %v183_v50  ;;  %v363_v56 = vpack.c.bf16 %v202_v53, %v201_v52  ;;  %v186_v58 = vld [vmem:[%s584_s3 + $0x68] sm:$0xff]  ;;  %v203_v60 = vld [vmem:[%s584_s3 + $0xf0] sm:$0xff] }
  0x10   :  { %138 = vmatprep.subr.bf16.mxu0 %v384_v9  ;;  %350 = vmatpush3.bf16.msra.mxu1 %v349_v32  ;;  %v185_v57 = vld [vmem:[%s584_s3 + $0x60] sm:$0xff]  ;;  %v204_v61 = vld [vmem:[%s584_s3 + $0xf8] sm:$0xff]  ;;  %v187_v63 = vld [vmem:[%s584_s3 + $0x70] sm:$0xff] }
  0x11   :  { %352 = vmatprep.subr.bf16.mxu1 %v351_v34  ;;  %v365_v59 = vpack.c.bf16 %v186_v58, %v185_v57  ;;  %v367_v62 = vpack.c.bf16 %v204_v61, %v203_v60  ;;  %v188_v0 = vld [vmem:[%s584_s3 + $0x78] sm:$0xff]  ;;  %v38_v5 = vld [vmem:[%s586_s2] sm:$0x3] }
  0x12   :  { %v369_v1 = vpack.c.bf16 %v188_v0, %v187_v63  ;;  %v43_v7 = vrot.slane %v38_v5, %v42_v4  ;;  %v47_v8 = vrot.slane %v38_v5, %v46_v6  ;;  %v303_v18 = vld [vmem:[%s587_s4] ss:$0 sm:$0xff] }
  0x13   :  { %139 = vmatpush1.bf16.msra.mxu0 %v386_v23 }
  0x14   :  { %140 = vmatprep.subr.bf16.mxu0 %v387_v25  ;;  %354 = vmatpush3.bf16.msra.mxu1 %v353_v40 }
  0x15   :  { %356 = vmatprep.subr.bf16.mxu1 %v355_v42 }
  0x17   :  { %141 = vmatpush1.bf16.msra.mxu0 %v389_v31 }
  0x18   :  { %142 = vmatprep.subr.bf16.mxu0 %v390_v33  ;;  %358 = vmatpush3.bf16.msra.mxu1 %v357_v48 }
  0x19   :  { %360 = vmatprep.subr.bf16.mxu1 %v359_v49 }
  0x1b   :  { %143 = vmatpush1.bf16.msra.mxu0 %v392_v39 }
  0x1c   :  { %144 = vmatprep.subr.bf16.mxu0 %v393_v41  ;;  %362 = vmatpush3.bf16.msra.mxu1 %v361_v55 }
  0x1d   :  { %364 = vmatprep.subr.bf16.mxu1 %v363_v56 }
  0x1f   :  { %145 = vmatpush1.bf16.msra.mxu0 %v395_v47 }
  0x20   :  { %366 = vmatpush3.bf16.msra.mxu1 %v365_v59 }
  0x21   :  { %368 = vmatprep.subr.bf16.mxu1 %v367_v62 }
  0x22   :  { %163 = vmatmul.mubr.bf16.vlgmr.msra.gmra.mrb[0].mxu0 %v21_v54 }
  0x24   :  { %370 = vmatpush3.bf16.msra.mxu1 %v369_v1 }
  0xf5   :  { %v164_v9 = vpop.f32.mrb[0].mxu0 }
  0xf6   :  { %v165_v10 = vadd.f32 %v164_v9, %v43_v7  ;;  %v166_v11 = vpop.f32.mrb[1].mxu0 }
  0xf7   :  { %v168_v12 = vpop.f32.mrb[2].mxu0  ;;  %v167_v13 = vadd.f32 %v166_v11, %v47_v8 }
  0xf8   :  { %v169_v14 = vpop.f32.mrb[3].mxu0  ;;  %v171_v16 = vmax.f32 %v165_v10, 0.0 }
  0xf9   :  { %v172_v15 = vmax.f32 %v167_v13, 0.0 }
  0xfb   :  { %276 = vmatprep.mubr.f32.mxu1 %v172_v15 }
  0xfc   :  { %277 = vmatmul.mubr.f32.vlgmr.msra.gmra.mrb[0].mxu1 %v171_v16 }
 0x1cf   :  { %v336_v17 = vpop.f32.mrb[0].mxu1 }
 0x1d0   :  { %v337_v19 = vpop.f32.mrb[1].mxu1 }
 0x1d1   :  { %v338_v20 = vadd.f32 %v337_v19, %v336_v17 }
 0x1d3   :  { %v279_v21 = vadd.f32 %v338_v20, %v303_v18 }
 0x1d5   :  { %282 = vst [vmem:[%s588_s5] sm:$0xff] %v279_v21 }

</bundles_post_ra>
